<compile_context>
chip_gen: v7x
topology: tpu7x:2x2x1
jax: 0.10.0
libtpu: 0.0.40
codegen_flags: <defaults>
</compile_context>

<pallas_src>
import functools

import jax
import jax.numpy as jnp
from jax.experimental import pallas as pl
from jax.experimental.pallas import tpu as pltpu

# ---------------- problem sizes (small, consistent with the module) ----------------
B = 2            # batch
N_Q = 8          # query tokens
N_K = 8          # key tokens
DIM = 32         # embedding dim
HEADS = 4        # num_heads (DIM must be divisible by num_heads)
HEAD_DIM = DIM // HEADS


def mha_atten_kernel(xq_ref, xk_ref, w_ref, out_ref, *, lane_dense):
    """One invocation computes the whole (B*H)-batched attention map.

    xq_ref : (B*H, N_q, D)    query, replicated over heads (host-side plumbing)
    xk_ref : (B*H, N_k, D)    key,   replicated over heads
    w_ref  : (2, B*H, D, hd)  [Wq ; Wk], head-major, replicated over batch
    out_ref: (B, H*N_q*N_k)   if lane_dense else (B*H, N_q, N_k)
    """
    hd = w_ref.shape[-1]
    scale = hd ** -0.5

    # ---- projections: two batched matmuls over the merged (b, h) batch dim ----
    q = jnp.einsum("bnd,bdf->bnf", xq_ref[...], w_ref[0],
                   preferred_element_type=jnp.float32) * scale      # (BH, Nq, hd)
    k = jnp.einsum("bnd,bdf->bnf", xk_ref[...], w_ref[1],
                   preferred_element_type=jnp.float32)              # (BH, Nk, hd)

    # ---- scores: contract head_dim directly (no transpose) ----
    s = jnp.einsum("bqd,bkd->bqk", q, k,
                   preferred_element_type=jnp.float32)              # (BH, Nq, Nk)

    # ---- softmax over keys (reciprocal on the EUP instead of a divide) ----
    m = jnp.max(s, axis=-1, keepdims=True)
    p = jnp.exp(s - m)
    l = jnp.sum(p, axis=-1, keepdims=True)
    attn = p * pl.reciprocal(l, approx=False)                       # (BH, Nq, Nk)

    if lane_dense:
        # row-major (b, h, q, k) folded into 256 lanes -> unmasked stores
        out_ref[...] = attn.reshape(out_ref.shape)
    else:
        out_ref[...] = attn


def multi_head_attention_atten_only(query, key, wq, wk, *, num_heads=HEADS):
    """query: (B, N_q, D); key: (B, N_k, D); wq/wk: (D, D) with y = x @ W.

    Returns the attention map (B, num_heads, N_q, N_k).
    """
    b, n_q, d = query.shape
    _, n_k, _ = key.shape
    h = num_heads
    hd = d // h

    # ---- host-side layout plumbing (no compute moved out of the kernel) ----
    # Head-major weights (D, D) -> (H, D, hd); replicate over batch and stack
    # Wq/Wk into one slab so the kernel sees a single leading (b*h) batch dim
    # and never slices / transposes / concatenates heads.
    wq_h = wq.reshape(d, h, hd).transpose(1, 0, 2)                  # (H, D, hd)
    wk_h = wk.reshape(d, h, hd).transpose(1, 0, 2)
    w_all = jnp.stack([wq_h, wk_h], axis=0)                         # (2, H, D, hd)
    w_all = jnp.broadcast_to(w_all[:, None], (2, b, h, d, hd)).reshape(2, b * h, d, hd)

    xq = jnp.broadcast_to(query[:, None], (b, h, n_q, d)).reshape(b * h, n_q, d)
    xk = jnp.broadcast_to(key[:, None], (b, h, n_k, d)).reshape(b * h, n_k, d)

    def run(lane_dense):
        if lane_dense:
            out_shape = jax.ShapeDtypeStruct((b, h * n_q * n_k), jnp.float32)
            out_spec = pl.BlockSpec((b, h * n_q * n_k), lambda i: (0, 0))
        else:
            out_shape = jax.ShapeDtypeStruct((b * h, n_q, n_k), jnp.float32)
            out_spec = pl.BlockSpec((b * h, n_q, n_k), lambda i: (0, 0, 0))
        out = pl.pallas_call(
            functools.partial(mha_atten_kernel, lane_dense=lane_dense),
            out_shape=out_shape,
            grid_spec=pltpu.PrefetchScalarGridSpec(
                num_scalar_prefetch=0,
                grid=(1,),  # whole (tiny) problem in one pipeline step
                in_specs=[
                    pl.BlockSpec((b * h, n_q, d), lambda i: (0, 0, 0)),
                    pl.BlockSpec((b * h, n_k, d), lambda i: (0, 0, 0)),
                    pl.BlockSpec((2, b * h, d, hd), lambda i: (0, 0, 0, 0)),
                ],
                out_specs=out_spec,
            ),
            compiler_params=pltpu.CompilerParams(
                dimension_semantics=("arbitrary",),
            ),
        )(xq, xk, w_all)
        return jax.block_until_ready(out)

    try:
        out = run(lane_dense=True)
    except Exception:
        # TODO(synk): if Mosaic rejects the in-kernel lane-fold reshape on some
        # TPU generations, fall back to the natural (B*H, Nq, Nk) store (the
        # output is ~2 KB, so masked partial stores cost almost nothing here).
        out = run(lane_dense=False)

    return out.reshape(b, h, n_q, n_k)


def reference(query, key, wq, wk, *, num_heads=HEADS):
    """Pure-JAX reference of MultiHeadAttention_atten_only.forward."""
    b, n_q, d = query.shape
    n_k = key.shape[1]
    hd = d // num_heads
    q = query @ wq
    k = key @ wk
    qh = q.reshape(b, n_q, num_heads, hd).transpose(0, 2, 1, 3)
    kh = k.reshape(b, n_k, num_heads, hd).transpose(0, 2, 1, 3)
    dots = jnp.einsum("bhid,bhjd->bhij", qh, kh) * hd ** -0.5
    return jax.nn.softmax(dots, axis=-1)


if __name__ == "__main__":
    rng = jax.random.PRNGKey(0)
    r_q, r_k, r_wq, r_wk = jax.random.split(rng, 4)

    query = jax.random.normal(r_q, (B, N_Q, DIM), jnp.float32)
    key = jax.random.normal(r_k, (B, N_K, DIM), jnp.float32)
    wq = 0.3 * jax.random.normal(r_wq, (DIM, DIM), jnp.float32)
    wk = 0.3 * jax.random.normal(r_wk, (DIM, DIM), jnp.float32)

    attn = multi_head_attention_atten_only(query, key, wq, wk)
    attn = jax.block_until_ready(attn)

    ref = reference(query, key, wq, wk)
    assert attn.shape == (B, HEADS, N_Q, N_K)
    assert jnp.allclose(jnp.sum(attn, axis=-1), 1.0, atol=1e-4), "softmax rows must sum to 1"
    assert jnp.allclose(attn, ref, atol=1e-4, rtol=1e-4), (
        f"max err {jnp.max(jnp.abs(attn - ref))}"
    )
    print("KERNEL_OK")
</pallas_src>

<mosaic_0001>
module attributes {stable_mosaic.version = 11 : i64} {
  func.func @mha_atten_kernel(%arg0: i32, %arg1: memref<8x8x32xf32, #tpu.memory_space<vmem>>, %arg2: memref<8x8x32xf32, #tpu.memory_space<vmem>>, %arg3: memref<2x8x32x8xf32, #tpu.memory_space<vmem>>, %arg4: memref<2x256xf32, #tpu.memory_space<vmem>>) attributes {dimension_semantics = [#tpu.dimension_semantics<arbitrary>], iteration_bounds = array<i64: 1>, scalar_prefetch = 0 : i64, scratch_operands = 0 : i64, tpu.core_type = #tpu.core_type<tc>, window_params = [{pipeline_mode = #tpu.pipeline_mode<synchronous>, transform_indices = @transform_0, window_bounds = array<i64: 8, 8, 32>}, {pipeline_mode = #tpu.pipeline_mode<synchronous>, transform_indices = @transform_1, window_bounds = array<i64: 8, 8, 32>}, {pipeline_mode = #tpu.pipeline_mode<synchronous>, transform_indices = @transform_2, window_bounds = array<i64: 2, 8, 32, 8>}, {pipeline_mode = #tpu.pipeline_mode<synchronous>, transform_indices = @transform_3, window_bounds = array<i64: 2, 256>}]} {
    %c0 = arith.constant 0 : index
    %c0_0 = arith.constant 0 : index
    %c0_1 = arith.constant 0 : index
    %0 = vector.load %arg1[%c0, %c0_0, %c0_1] : memref<8x8x32xf32, #tpu.memory_space<vmem>>, vector<8x8x32xf32>
    %c0_2 = arith.constant 0 : index
    %c0_3 = arith.constant 0 : index
    %c0_4 = arith.constant 0 : index
    %c0_5 = arith.constant 0 : index
    %1 = vector.load %arg3[%c0_2, %c0_3, %c0_4, %c0_5] : memref<2x8x32x8xf32, #tpu.memory_space<vmem>>, vector<1x8x32x8xf32>
    %2 = vector.shape_cast %1 : vector<1x8x32x8xf32> to vector<8x32x8xf32>
    "tpu.trace_start"() <{level = 10 : i32, message = "bnd,bdf->bnf"}> : () -> ()
    %cst = arith.constant dense<0.000000e+00> : vector<8x8x8xf32>
    %3 = tpu.matmul %0, %2, %cst {dimension_numbers = #tpu.dot_dimension_numbers<[2], [1], [1], [2], [0, 0, 0, 1, 1, 2], [0], [0]>} : vector<8x8x32xf32>, vector<8x32x8xf32>, vector<8x8x8xf32> -> vector<8x8x8xf32>
    "tpu.trace_stop"() : () -> ()
    %cst_6 = arith.constant 0.353553385 : f32
    %4 = vector.broadcast %cst_6 : f32 to vector<8x8x8xf32>
    %5 = arith.mulf %3, %4 : vector<8x8x8xf32>
    %c0_7 = arith.constant 0 : index
    %c0_8 = arith.constant 0 : index
    %c0_9 = arith.constant 0 : index
    %6 = vector.load %arg2[%c0_7, %c0_8, %c0_9] : memref<8x8x32xf32, #tpu.memory_space<vmem>>, vector<8x8x32xf32>
    %c1 = arith.constant 1 : index
    %c0_10 = arith.constant 0 : index
    %c0_11 = arith.constant 0 : index
    %c0_12 = arith.constant 0 : index
    %7 = vector.load %arg3[%c1, %c0_10, %c0_11, %c0_12] : memref<2x8x32x8xf32, #tpu.memory_space<vmem>>, vector<1x8x32x8xf32>
    %8 = vector.shape_cast %7 : vector<1x8x32x8xf32> to vector<8x32x8xf32>
    "tpu.trace_start"() <{level = 10 : i32, message = "bnd,bdf->bnf"}> : () -> ()
    %cst_13 = arith.constant dense<0.000000e+00> : vector<8x8x8xf32>
    %9 = tpu.matmul %6, %8, %cst_13 {dimension_numbers = #tpu.dot_dimension_numbers<[2], [1], [1], [2], [0, 0, 0, 1, 1, 2], [0], [0]>} : vector<8x8x32xf32>, vector<8x32x8xf32>, vector<8x8x8xf32> -> vector<8x8x8xf32>
    "tpu.trace_stop"() : () -> ()
    "tpu.trace_start"() <{level = 10 : i32, message = "bqd,bkd->bqk"}> : () -> ()
    %cst_14 = arith.constant dense<0.000000e+00> : vector<8x8x8xf32>
    %10 = tpu.matmul %5, %9, %cst_14 {dimension_numbers = #tpu.dot_dimension_numbers<[2], [2], [1], [1], [0, 0, 0, 1, 1, 1], [0], [0]>} : vector<8x8x8xf32>, vector<8x8x8xf32>, vector<8x8x8xf32> -> vector<8x8x8xf32>
    "tpu.trace_stop"() : () -> ()
    %cst_15 = arith.constant dense<0xFF800000> : vector<8x8xf32>
    %11 = vector.multi_reduction <maximumf>, %10, %cst_15 [2] : vector<8x8x8xf32> to vector<8x8xf32>
    %12 = vector.shape_cast %11 : vector<8x8xf32> to vector<8x8x1xf32>
    %13 = vector.broadcast %12 : vector<8x8x1xf32> to vector<8x8x8xf32>
    %14 = arith.subf %10, %13 : vector<8x8x8xf32>
    %15 = math.exp %14 : vector<8x8x8xf32>
    %cst_16 = arith.constant dense<0.000000e+00> : vector<8x8xf32>
    %16 = vector.multi_reduction <add>, %15, %cst_16 [2] : vector<8x8x8xf32> to vector<8x8xf32>
    %17 = vector.shape_cast %16 : vector<8x8xf32> to vector<8x8x1xf32>
    %18 = tpu.reciprocal %17 : vector<8x8x1xf32> -> vector<8x8x1xf32>
    %19 = vector.broadcast %18 : vector<8x8x1xf32> to vector<8x8x8xf32>
    %20 = arith.mulf %15, %19 : vector<8x8x8xf32>
    %21 = vector.shape_cast %20 : vector<8x8x8xf32> to vector<2x256xf32>
    %c0_17 = arith.constant 0 : index
    %c0_18 = arith.constant 0 : index
    %22 = vector.load %arg4[%c0_17, %c0_18] : memref<2x256xf32, #tpu.memory_space<vmem>>, vector<2x256xf32>
    tpu.vector_store %arg4[%c0_17, %c0_18], %21 {strides = array<i32>} : memref<2x256xf32, #tpu.memory_space<vmem>>, vector<2x256xf32>,
    return
  }
  func.func @transform_0(%arg0: i32) -> (i32, i32, i32) {
    %c0_i32 = arith.constant 0 : i32
    %c0_i32_0 = arith.constant 0 : i32
    %c0_i32_1 = arith.constant 0 : i32
    %c0_i32_2 = arith.constant 0 : i32
    return %c0_i32, %c0_i32_0, %c0_i32_1 : i32, i32, i32
  }
  func.func @transform_1(%arg0: i32) -> (i32, i32, i32) {
    %c0_i32 = arith.constant 0 : i32
    %c0_i32_0 = arith.constant 0 : i32
    %c0_i32_1 = arith.constant 0 : i32
    %c0_i32_2 = arith.constant 0 : i32
    return %c0_i32, %c0_i32_0, %c0_i32_1 : i32, i32, i32
  }
  func.func @transform_2(%arg0: i32) -> (i32, i32, i32, i32) {
    %c0_i32 = arith.constant 0 : i32
    %c0_i32_0 = arith.constant 0 : i32
    %c0_i32_1 = arith.constant 0 : i32
    %c0_i32_2 = arith.constant 0 : i32
    %c0_i32_3 = arith.constant 0 : i32
    return %c0_i32, %c0_i32_0, %c0_i32_1, %c0_i32_2 : i32, i32, i32, i32
  }
  func.func @transform_3(%arg0: i32) -> (i32, i32) {
    %c0_i32 = arith.constant 0 : i32
    %c0_i32_0 = arith.constant 0 : i32
    %c0_i32_1 = arith.constant 0 : i32
    return %c0_i32, %c0_i32_0 : i32, i32
  }
}

module attributes {stable_mosaic.version = 11 : i64} {
  func.func @mha_atten_kernel(%arg0: i32, %arg1: memref<8x8x32xf32, #tpu.memory_space<vmem>>, %arg2: memref<8x8x32xf32, #tpu.memory_space<vmem>>, %arg3: memref<2x8x32x8xf32, #tpu.memory_space<vmem>>, %arg4: memref<8x8x8xf32, #tpu.memory_space<vmem>>) attributes {dimension_semantics = [#tpu.dimension_semantics<arbitrary>], iteration_bounds = array<i64: 1>, scalar_prefetch = 0 : i64, scratch_operands = 0 : i64, tpu.core_type = #tpu.core_type<tc>, window_params = [{pipeline_mode = #tpu.pipeline_mode<synchronous>, transform_indices = @transform_0, window_bounds = array<i64: 8, 8, 32>}, {pipeline_mode = #tpu.pipeline_mode<synchronous>, transform_indices = @transform_1, window_bounds = array<i64: 8, 8, 32>}, {pipeline_mode = #tpu.pipeline_mode<synchronous>, transform_indices = @transform_2, window_bounds = array<i64: 2, 8, 32, 8>}, {pipeline_mode = #tpu.pipeline_mode<synchronous>, transform_indices = @transform_3, window_bounds = array<i64: 8, 8, 8>}]} {
    %c0 = arith.constant 0 : index
    %c0_0 = arith.constant 0 : index
    %c0_1 = arith.constant 0 : index
    %0 = vector.load %arg1[%c0, %c0_0, %c0_1] : memref<8x8x32xf32, #tpu.memory_space<vmem>>, vector<8x8x32xf32>
    %c0_2 = arith.constant 0 : index
    %c0_3 = arith.constant 0 : index
    %c0_4 = arith.constant 0 : index
    %c0_5 = arith.constant 0 : index
    %1 = vector.load %arg3[%c0_2, %c0_3, %c0_4, %c0_5] : memref<2x8x32x8xf32, #tpu.memory_space<vmem>>, vector<1x8x32x8xf32>
    %2 = vector.shape_cast %1 : vector<1x8x32x8xf32> to vector<8x32x8xf32>
    "tpu.trace_start"() <{level = 10 : i32, message = "bnd,bdf->bnf"}> : () -> ()
    %cst = arith.constant dense<0.000000e+00> : vector<8x8x8xf32>
    %3 = tpu.matmul %0, %2, %cst {dimension_numbers = #tpu.dot_dimension_numbers<[2], [1], [1], [2], [0, 0, 0, 1, 1, 2], [0], [0]>} : vector<8x8x32xf32>, vector<8x32x8xf32>, vector<8x8x8xf32> -> vector<8x8x8xf32>
    "tpu.trace_stop"() : () -> ()
    %cst_6 = arith.constant 0.353553385 : f32
    %4 = vector.broadcast %cst_6 : f32 to vector<8x8x8xf32>
    %5 = arith.mulf %3, %4 : vector<8x8x8xf32>
    %c0_7 = arith.constant 0 : index
    %c0_8 = arith.constant 0 : index
    %c0_9 = arith.constant 0 : index
    %6 = vector.load %arg2[%c0_7, %c0_8, %c0_9] : memref<8x8x32xf32, #tpu.memory_space<vmem>>, vector<8x8x32xf32>
    %c1 = arith.constant 1 : index
    %c0_10 = arith.constant 0 : index
    %c0_11 = arith.constant 0 : index
    %c0_12 = arith.constant 0 : index
    %7 = vector.load %arg3[%c1, %c0_10, %c0_11, %c0_12] : memref<2x8x32x8xf32, #tpu.memory_space<vmem>>, vector<1x8x32x8xf32>
    %8 = vector.shape_cast %7 : vector<1x8x32x8xf32> to vector<8x32x8xf32>
    "tpu.trace_start"() <{level = 10 : i32, message = "bnd,bdf->bnf"}> : () -> ()
    %cst_13 = arith.constant dense<0.000000e+00> : vector<8x8x8xf32>
    %9 = tpu.matmul %6, %8, %cst_13 {dimension_numbers = #tpu.dot_dimension_numbers<[2], [1], [1], [2], [0, 0, 0, 1, 1, 2], [0], [0]>} : vector<8x8x32xf32>, vector<8x32x8xf32>, vector<8x8x8xf32> -> vector<8x8x8xf32>
    "tpu.trace_stop"() : () -> ()
    "tpu.trace_start"() <{level = 10 : i32, message = "bqd,bkd->bqk"}> : () -> ()
    %cst_14 = arith.constant dense<0.000000e+00> : vector<8x8x8xf32>
    %10 = tpu.matmul %5, %9, %cst_14 {dimension_numbers = #tpu.dot_dimension_numbers<[2], [2], [1], [1], [0, 0, 0, 1, 1, 1], [0], [0]>} : vector<8x8x8xf32>, vector<8x8x8xf32>, vector<8x8x8xf32> -> vector<8x8x8xf32>
    "tpu.trace_stop"() : () -> ()
    %cst_15 = arith.constant dense<0xFF800000> : vector<8x8xf32>
    %11 = vector.multi_reduction <maximumf>, %10, %cst_15 [2] : vector<8x8x8xf32> to vector<8x8xf32>
    %12 = vector.shape_cast %11 : vector<8x8xf32> to vector<8x8x1xf32>
    %13 = vector.broadcast %12 : vector<8x8x1xf32> to vector<8x8x8xf32>
    %14 = arith.subf %10, %13 : vector<8x8x8xf32>
    %15 = math.exp %14 : vector<8x8x8xf32>
    %cst_16 = arith.constant dense<0.000000e+00> : vector<8x8xf32>
    %16 = vector.multi_reduction <add>, %15, %cst_16 [2] : vector<8x8x8xf32> to vector<8x8xf32>
    %17 = vector.shape_cast %16 : vector<8x8xf32> to vector<8x8x1xf32>
    %18 = tpu.reciprocal %17 : vector<8x8x1xf32> -> vector<8x8x1xf32>
    %19 = vector.broadcast %18 : vector<8x8x1xf32> to vector<8x8x8xf32>
    %20 = arith.mulf %15, %19 : vector<8x8x8xf32>
    %c0_17 = arith.constant 0 : index
    %c0_18 = arith.constant 0 : index
    %c0_19 = arith.constant 0 : index
    %21 = vector.load %arg4[%c0_17, %c0_18, %c0_19] : memref<8x8x8xf32, #tpu.memory_space<vmem>>, vector<8x8x8xf32>
    tpu.vector_store %arg4[%c0_17, %c0_18, %c0_19], %20 {strides = array<i32>} : memref<8x8x8xf32, #tpu.memory_space<vmem>>, vector<8x8x8xf32>,
    return
  }
  func.func @transform_0(%arg0: i32) -> (i32, i32, i32) {
    %c0_i32 = arith.constant 0 : i32
    %c0_i32_0 = arith.constant 0 : i32
    %c0_i32_1 = arith.constant 0 : i32
    %c0_i32_2 = arith.constant 0 : i32
    return %c0_i32, %c0_i32_0, %c0_i32_1 : i32, i32, i32
  }
  func.func @transform_1(%arg0: i32) -> (i32, i32, i32) {
    %c0_i32 = arith.constant 0 : i32
    %c0_i32_0 = arith.constant 0 : i32
    %c0_i32_1 = arith.constant 0 : i32
    %c0_i32_2 = arith.constant 0 : i32
    return %c0_i32, %c0_i32_0, %c0_i32_1 : i32, i32, i32
  }
  func.func @transform_2(%arg0: i32) -> (i32, i32, i32, i32) {
    %c0_i32 = arith.constant 0 : i32
    %c0_i32_0 = arith.constant 0 : i32
    %c0_i32_1 = arith.constant 0 : i32
    %c0_i32_2 = arith.constant 0 : i32
    %c0_i32_3 = arith.constant 0 : i32
    return %c0_i32, %c0_i32_0, %c0_i32_1, %c0_i32_2 : i32, i32, i32, i32
  }
  func.func @transform_3(%arg0: i32) -> (i32, i32, i32) {
    %c0_i32 = arith.constant 0 : i32
    %c0_i32_0 = arith.constant 0 : i32
    %c0_i32_1 = arith.constant 0 : i32
    %c0_i32_2 = arith.constant 0 : i32
    return %c0_i32, %c0_i32_0, %c0_i32_1 : i32, i32, i32
  }
}

</mosaic_0001>

<bundles_post_ra>
// kernel: tpu_custom_call.1
= control target key start
LH: loop header
LB: loop body
LE: loop exit
PB: predicated region body
PF: predicated region fallthrough
CT: control target
= control target key end

     0   :  { %v2528_v3 = vmov 0.0|0.0   ;;  %vm2529_vm0 = vmmov 0   ;;  %v2530_v11 = vmov 0.0   ;;  %vm55_vm1 = vcmask 261120   ;;  %s2950_s0 = inlined_call_operand.vmem [shape: f32[8,8,32], index: 0, kind: input, shape index: {}]   ;;  %s2951_s1 = inlined_call_operand.vmem [shape: f32[8,8,32], index: 1, kind: input, shape index: {}]   ;;  %s2952_s2 = inlined_call_operand.vmem [shape: f32[2,8,32,8], index: 2, kind: input, shape index: {}]   ;;  %s2953_s3 = inlined_call_operand.hbm [shape: f32[8,8,8], index: 3, kind: output, shape index: {}]  }
   0x1   :  { %v23_v0 = vld [vmem:[%s2952_s2] sm:$0xff]  ;;  %v24_v1 = vld [vmem:[%s2952_s2 + $0x8] sm:$0xff]  ;;  %2370 = vmatprep.subr.bf16.mxu0 %v2528_v3  ;;  %2376 = vmatprep.subr.bf16.mxu1 %v2528_v3  ;;  %v25_v6 = vld [vmem:[%s2952_s2 + $0x10] sm:$0xff] }
   0x2   :  { %v27_v2 = vld [vmem:[%s2952_s2 + $0x20] sm:$0xff]  ;;  %v2371_v4 = vpack.c.bf16 %v24_v1, %v23_v0  ;;  %v28_v5 = vld [vmem:[%s2952_s2 + $0x28] sm:$0xff]  ;;  %v26_v7 = vld [vmem:[%s2952_s2 + $0x18] sm:$0xff]  ;;  %2162 = vmatprep.mubr.msk.f32.mxu0 %vm2529_vm0, %v2530_v11  ;;  %2173 = vmatprep.mubr.msk.f32.mxu1 %vm2529_vm0, %v2530_v11 }
   0x3   :  { %v2377_v8 = vpack.c.bf16 %v28_v5, %v27_v2  ;;  %v29_v9 = vld [vmem:[%s2952_s2 + $0x30] sm:$0xff]  ;;  %v30_v10 = vld [vmem:[%s2952_s2 + $0x38] sm:$0xff]  ;;  %v2374_v12 = vpack.c.bf16 %v26_v7, %v25_v6  ;;  %v31_v14 = vld [vmem:[%s2952_s2 + $0x40] sm:$0xff] }
   0x4   :  { %2372 = vmatpush3.bf16.msra.mxu0 %v2371_v4  ;;  %v2380_v13 = vpack.c.bf16 %v30_v10, %v29_v9  ;;  %v32_v15 = vld [vmem:[%s2952_s2 + $0x48] sm:$0xff]  ;;  %v35_v16 = vld [vmem:[%s2952_s2 + $0x60] sm:$0xff]  ;;  %v33_v22 = vld [vmem:[%s2952_s2 + $0x50] sm:$0xff] }
   0x5   :  { %2378 = vmatpush3.bf16.msra.mxu1 %v2377_v8  ;;  %2373 = vmatprep.subr.bf16.mxu0 %v2528_v3  ;;  %v36_v17 = vld [vmem:[%s2952_s2 + $0x68] sm:$0xff]  ;;  %v15_v18 = vld [vmem:[%s2950_s0] sm:$0xff]  ;;  %v2383_v19 = vpack.c.bf16 %v32_v15, %v31_v14  ;;  %v34_v23 = vld [vmem:[%s2952_s2 + $0x58] sm:$0xff] }
   0x6   :  { %2379 = vmatprep.subr.bf16.mxu1 %v2528_v3  ;;  %v16_v20 = vld [vmem:[%s2950_s0 + $0x8] sm:$0xff]  ;;  %v2389_v21 = vpack.c.bf16 %v36_v17, %v35_v16  ;;  %v37_v24 = vld [vmem:[%s2952_s2 + $0x70] sm:$0xff]  ;;  %v38_v25 = vld [vmem:[%s2952_s2 + $0x78] sm:$0xff]  ;;  %v2386_v26 = vpack.c.bf16 %v34_v23, %v33_v22 }
   0x7   :  { %v2392_v27 = vpack.c.bf16 %v38_v25, %v37_v24  ;;  %v39_v28 = vld [vmem:[%s2952_s2 + $0x80] sm:$0xff]  ;;  %v40_v29 = vld [vmem:[%s2952_s2 + $0x88] sm:$0xff]  ;;  %v17_v32 = vld [vmem:[%s2950_s0 + $0x10] sm:$0xff] }
   0x8   :  { %2375 = vmatpush3.bf16.msra.mxu0 %v2374_v12  ;;  %v43_v30 = vld [vmem:[%s2952_s2 + $0xa0] sm:$0xff]  ;;  %v44_v31 = vld [vmem:[%s2952_s2 + $0xa8] sm:$0xff]  ;;  %v2395_v33 = vpack.c.bf16 %v40_v29, %v39_v28  ;;  %v18_v34 = vld [vmem:[%s2950_s0 + $0x18] sm:$0xff] }
   0x9   :  { %2381 = vmatpush3.bf16.msra.mxu1 %v2380_v13  ;;  %2382 = vmatprep.subr.bf16.mxu0 %v2528_v3  ;;  %v2401_v35 = vpack.c.bf16 %v44_v31, %v43_v30  ;;  %v41_v36 = vld [vmem:[%s2952_s2 + $0x90] sm:$0xff]  ;;  %v42_v37 = vld [vmem:[%s2952_s2 + $0x98] sm:$0xff]  ;;  %v47_v42 = vld [vmem:[%s2952_s2 + $0xc0] sm:$0xff] }
   0xa   :  { %2388 = vmatprep.subr.bf16.mxu1 %v2528_v3  ;;  %v45_v38 = vld [vmem:[%s2952_s2 + $0xb0] sm:$0xff]  ;;  %v46_v39 = vld [vmem:[%s2952_s2 + $0xb8] sm:$0xff]  ;;  %v2398_v40 = vpack.c.bf16 %v42_v37, %v41_v36  ;;  %v48_v43 = vld [vmem:[%s2952_s2 + $0xc8] sm:$0xff] }
   0xb   :  { %2163 = vmatmul.mubr.msk.f32.vlgmr.msra.gmra.mrb[0].mxu0 %vm55_vm1, %v15_v18  ;;  %v2404_v41 = vpack.c.bf16 %v46_v39, %v45_v38  ;;  %v51_v44 = vld [vmem:[%s2952_s2 + $0xe0] sm:$0xff]  ;;  %v52_v45 = vld [vmem:[%s2952_s2 + $0xe8] sm:$0xff]  ;;  %v2407_v47 = vpack.c.bf16 %v48_v43, %v47_v42  ;;  %v49_v50 = vld [vmem:[%s2952_s2 + $0xd0] sm:$0xff] }
   0xc   :  { %2174 = vmatmul.mubr.msk.f32.vlgmr.msra.gmra.mrb[0].mxu1 %vm55_vm1, %v16_v20  ;;  %2384 = vmatpush3.bf16.msra.mxu0 %v2383_v19  ;;  %v19_v46 = vld [vmem:[%s2950_s0 + $0x20] sm:$0xff]  ;;  %v20_v48 = vld [vmem:[%s2950_s0 + $0x28] sm:$0xff]  ;;  %v2413_v49 = vpack.c.bf16 %v52_v45, %v51_v44  ;;  %v50_v51 = vld [vmem:[%s2952_s2 + $0xd8] sm:$0xff] }
   0xd   :  { %2390 = vmatpush3.bf16.msra.mxu1 %v2389_v21  ;;  %2385 = vmatprep.subr.bf16.mxu0 %v2528_v3  ;;  %v53_v52 = vld [vmem:[%s2952_s2 + $0xf0] sm:$0xff]  ;;  %v54_v53 = vld [vmem:[%s2952_s2 + $0xf8] sm:$0xff] }
   0xe   :  { %2391 = vmatprep.subr.bf16.mxu1 %v2528_v3  ;;  %2184 = vmatprep.mubr.msk.f32.mxu0 %vm2529_vm0, %v2530_v11 }
   0xf   :  { %2195 = vmatprep.mubr.msk.f32.mxu1 %vm2529_vm0, %v2530_v11 }
  0x10   :  { %2387 = vmatpush3.bf16.msra.mxu0 %v2386_v26 }
  0x11   :  { %2393 = vmatpush3.bf16.msra.mxu1 %v2392_v27  ;;  %2394 = vmatprep.subr.bf16.mxu0 %v2528_v3 }
  0x12   :  { %2400 = vmatprep.subr.bf16.mxu1 %v2528_v3 }
  0x13   :  { %2185 = vmatmul.mubr.msk.f32.vlgmr.msra.gmra.mrb[2].mxu0 %vm55_vm1, %v17_v32 }
  0x14   :  { %2196 = vmatmul.mubr.msk.f32.vlgmr.msra.gmra.mrb[2].mxu1 %vm55_vm1, %v18_v34  ;;  %2396 = vmatpush3.bf16.msra.mxu0 %v2395_v33 }
  0x15   :  { %2402 = vmatpush3.bf16.msra.mxu1 %v2401_v35  ;;  %2397 = vmatprep.subr.bf16.mxu0 %v2528_v3 }
  0x16   :  { %2403 = vmatprep.subr.bf16.mxu1 %v2528_v3  ;;  %2206 = vmatprep.mubr.msk.f32.mxu0 %vm2529_vm0, %v2530_v11 }
  0x17   :  { %2217 = vmatprep.mubr.msk.f32.mxu1 %vm2529_vm0, %v2530_v11 }
  0x18   :  { %2399 = vmatpush3.bf16.msra.mxu0 %v2398_v40 }
  0x19   :  { %2405 = vmatpush3.bf16.msra.mxu1 %v2404_v41  ;;  %2406 = vmatprep.subr.bf16.mxu0 %v2528_v3 }
  0x1a   :  { %2412 = vmatprep.subr.bf16.mxu1 %v2528_v3 }
  0x1b   :  { %2207 = vmatmul.mubr.msk.f32.vlgmr.msra.gmra.mrb[4].mxu0 %vm55_vm1, %v19_v46 }
  0x1c   :  { %8 = vsyncpa [#allocation3], 0  ;;  %2218 = vmatmul.mubr.msk.f32.vlgmr.msra.gmra.mrb[4].mxu1 %vm55_vm1, %v20_v48  ;;  %2408 = vmatpush3.bf16.msra.mxu0 %v2407_v47  ;;  %v2410_v54 = vpack.c.bf16 %v50_v51, %v49_v50  ;;  %v2416_v55 = vpack.c.bf16 %v54_v53, %v53_v52  ;;  %v2002_v56 = vld [vmem:[%s2952_s2 + $0x100] sm:$0xff]  ;;  %v2003_v57 = vld [vmem:[%s2952_s2 + $0x108] sm:$0xff]  ;;  %vm1273_vm2 = vcmask 64512  }
  0x1d   :  { %2414 = vmatpush3.bf16.msra.mxu1 %v2413_v49  ;;  %2409 = vmatprep.subr.bf16.mxu0 %v2528_v3  ;;  %v2006_v58 = vld [vmem:[%s2952_s2 + $0x120] sm:$0xff]  ;;  %v2007_v59 = vld [vmem:[%s2952_s2 + $0x128] sm:$0xff]  ;;  %v21_v60 = vld [vmem:[%s2950_s0 + $0x30] sm:$0xff]  ;;  %v2419_v61 = vpack.c.bf16 %v2003_v57, %v2002_v56 }
  0x1e   :  { %2415 = vmatprep.subr.bf16.mxu1 %v2528_v3  ;;  %2228 = vmatprep.mubr.msk.f32.mxu0 %vm2529_vm0, %v2530_v11  ;;  %v22_v62 = vld [vmem:[%s2950_s0 + $0x38] sm:$0xff]  ;;  %v2425_v63 = vpack.c.bf16 %v2007_v59, %v2006_v58  ;;  %v2004_v0 = vld [vmem:[%s2952_s2 + $0x110] sm:$0xff]  ;;  %v2010_v7 = vld [vmem:[%s2952_s2 + $0x140] sm:$0xff] }
  0x1f   :  { %2239 = vmatprep.mubr.msk.f32.mxu1 %vm2529_vm0, %v2530_v11  ;;  %v2005_v1 = vld [vmem:[%s2952_s2 + $0x118] sm:$0xff]  ;;  %v2008_v2 = vld [vmem:[%s2952_s2 + $0x130] sm:$0xff]  ;;  %v2011_v8 = vld [vmem:[%s2952_s2 + $0x148] sm:$0xff] }
  0x20   :  { %2411 = vmatpush3.bf16.msra.mxu0 %v2410_v54  ;;  %v2009_v4 = vld [vmem:[%s2952_s2 + $0x138] sm:$0xff]  ;;  %v2422_v5 = vpack.c.bf16 %v2005_v1, %v2004_v0  ;;  %v2014_v9 = vld [vmem:[%s2952_s2 + $0x160] sm:$0xff]  ;;  %v2015_v10 = vld [vmem:[%s2952_s2 + $0x168] sm:$0xff]  ;;  %v2431_v13 = vpack.c.bf16 %v2011_v8, %v2010_v7 }
  0x21   :  { %2417 = vmatpush3.bf16.msra.mxu1 %v2416_v55  ;;  %2418 = vmatprep.subr.bf16.mxu0 %v2528_v3  ;;  %v2428_v6 = vpack.c.bf16 %v2009_v4, %v2008_v2  ;;  %v648_v12 = vld [vmem:[%s2951_s1] sm:$0xff]  ;;  %v649_v14 = vld [vmem:[%s2951_s1 + $0x8] sm:$0xff]  ;;  %v2437_v15 = vpack.c.bf16 %v2015_v10, %v2014_v9  ;;  %v2012_v16 = vld [vmem:[%s2952_s2 + $0x150] sm:$0xff] }
  0x22   :  { %2424 = vmatprep.subr.bf16.mxu1 %v2528_v3  ;;  %v2013_v17 = vld [vmem:[%s2952_s2 + $0x158] sm:$0xff]  ;;  %v2016_v18 = vld [vmem:[%s2952_s2 + $0x170] sm:$0xff]  ;;  %v2018_v22 = vld [vmem:[%s2952_s2 + $0x180] sm:$0xff] }
  0x23   :  { %2229 = vmatmul.mubr.msk.f32.vlgmr.msra.gmra.mrb[6].mxu0 %vm55_vm1, %v21_v60  ;;  %v2017_v19 = vld [vmem:[%s2952_s2 + $0x178] sm:$0xff]  ;;  %v2434_v20 = vpack.c.bf16 %v2013_v17, %v2012_v16  ;;  %v2019_v23 = vld [vmem:[%s2952_s2 + $0x188] sm:$0xff]  ;;  %v2022_v24 = vld [vmem:[%s2952_s2 + $0x1a0] sm:$0xff] }
  0x24   :  { %2240 = vmatmul.mubr.msk.f32.vlgmr.msra.gmra.mrb[6].mxu1 %vm55_vm1, %v22_v62  ;;  %2420 = vmatpush3.bf16.msra.mxu0 %v2419_v61  ;;  %v2440_v21 = vpack.c.bf16 %v2017_v19, %v2016_v18  ;;  %v2023_v25 = vld [vmem:[%s2952_s2 + $0x1a8] sm:$0xff]  ;;  %v650_v26 = vld [vmem:[%s2951_s1 + $0x10] sm:$0xff]  ;;  %v2443_v27 = vpack.c.bf16 %v2019_v23, %v2018_v22  ;;  %v651_v28 = vld [vmem:[%s2951_s1 + $0x18] sm:$0xff] }
  0x25   :  { %2426 = vmatpush3.bf16.msra.mxu1 %v2425_v63  ;;  %2421 = vmatprep.subr.bf16.mxu0 %v2528_v3  ;;  %v2449_v29 = vpack.c.bf16 %v2023_v25, %v2022_v24  ;;  %v2020_v30 = vld [vmem:[%s2952_s2 + $0x190] sm:$0xff]  ;;  %v2021_v31 = vld [vmem:[%s2952_s2 + $0x198] sm:$0xff]  ;;  %v2026_v36 = vld [vmem:[%s2952_s2 + $0x1c0] sm:$0xff] }
  0x26   :  { %2427 = vmatprep.subr.bf16.mxu1 %v2528_v3  ;;  %2250 = vmatprep.mubr.msk.f32.mxu0 %vm2529_vm0, %v2530_v11  ;;  %v2024_v32 = vld [vmem:[%s2952_s2 + $0x1b0] sm:$0xff]  ;;  %v2025_v33 = vld [vmem:[%s2952_s2 + $0x1b8] sm:$0xff]  ;;  %v2446_v34 = vpack.c.bf16 %v2021_v31, %v2020_v30  ;;  %v2027_v37 = vld [vmem:[%s2952_s2 + $0x1c8] sm:$0xff] }
  0x27   :  { %2261 = vmatprep.mubr.msk.f32.mxu1 %vm2529_vm0, %v2530_v11  ;;  %v2452_v35 = vpack.c.bf16 %v2025_v33, %v2024_v32  ;;  %v2030_v38 = vld [vmem:[%s2952_s2 + $0x1e0] sm:$0xff]  ;;  %v2031_v39 = vld [vmem:[%s2952_s2 + $0x1e8] sm:$0xff]  ;;  %v2455_v41 = vpack.c.bf16 %v2027_v37, %v2026_v36  ;;  %v2028_v44 = vld [vmem:[%s2952_s2 + $0x1d0] sm:$0xff] }
  0x28   :  { %2423 = vmatpush3.bf16.msra.mxu0 %v2422_v5  ;;  %v652_v40 = vld [vmem:[%s2951_s1 + $0x20] sm:$0xff]  ;;  %v653_v42 = vld [vmem:[%s2951_s1 + $0x28] sm:$0xff]  ;;  %v2461_v43 = vpack.c.bf16 %v2031_v39, %v2030_v38  ;;  %v2029_v45 = vld [vmem:[%s2952_s2 + $0x1d8] sm:$0xff] }
  0x29   :  { %2429 = vmatpush3.bf16.msra.mxu1 %v2428_v6  ;;  %2430 = vmatprep.subr.bf16.mxu0 %v2528_v3  ;;  %v2032_v46 = vld [vmem:[%s2952_s2 + $0x1f0] sm:$0xff]  ;;  %v2033_v47 = vld [vmem:[%s2952_s2 + $0x1f8] sm:$0xff]  ;;  %v2458_v48 = vpack.c.bf16 %v2029_v45, %v2028_v44 }
  0x2a   :  { %2436 = vmatprep.subr.bf16.mxu1 %v2528_v3  ;;  %v2464_v49 = vpack.c.bf16 %v2033_v47, %v2032_v46  ;;  %v654_v50 = vld [vmem:[%s2951_s1 + $0x30] sm:$0xff]  ;;  %v655_v51 = vld [vmem:[%s2951_s1 + $0x38] sm:$0xff]  ;;  %s2531_s1 = smov [#allocation2]  }
  0x2b   :  { %2251 = vmatmul.mubr.msk.f32.vlgmr.msra.gmra.mrb[8].mxu0 %vm55_vm1, %v648_v12  ;;  %s1983_s6 = sshll.u32 %s2531_s1, 4  ;;  %s1984_s6 = int_to_ptr.vmem [resolvable:$true] %s1983_s6 }
  0x2c   :  { %2262 = vmatmul.mubr.msk.f32.vlgmr.msra.gmra.mrb[8].mxu1 %vm55_vm1, %v649_v14  ;;  %2432 = vmatpush3.bf16.msra.mxu0 %v2431_v13  ;;  %s2504_s7 = scalar_lea.vmem %s1984_s6, 1024  ;;  %p2509_p1 = scmp.lt.s32.totalorder %s1984_s6, %s1984_s6 }
  0x2d   :  { %2438 = vmatpush3.bf16.msra.mxu1 %v2437_v15  ;;  %2433 = vmatprep.subr.bf16.mxu0 %v2528_v3  ;;  %p2505_p0 = scmp.ne.s32.totalorder %s1984_s6, %s2504_s7  ;;  %p2510_p2 = scmp.lt.s32.totalorder %s2504_s7, %s2504_s7 }
  0x2e   :  { %2439 = vmatprep.subr.bf16.mxu1 %v2528_v3  ;;  %2272 = vmatprep.mubr.msk.f32.mxu0 %vm2529_vm0, %v2530_v11 }
  0x2f   :  { %2283 = vmatprep.mubr.msk.f32.mxu1 %vm2529_vm0, %v2530_v11  ;;  %p2511_p3 = por %p2510_p2, %p2509_p1 }
  0x30   :  { %2435 = vmatpush3.bf16.msra.mxu0 %v2434_v20 }
  0x31   :  { %2441 = vmatpush3.bf16.msra.mxu1 %v2440_v21  ;;  %2442 = vmatprep.subr.bf16.mxu0 %v2528_v3  ;;  %p2512_p4 = pnand %p2511_p3, %p2505_p0 }
  0x32   :  { %2448 = vmatprep.subr.bf16.mxu1 %v2528_v3 }
  0x33   :  { %2273 = vmatmul.mubr.msk.f32.vlgmr.msra.gmra.mrb[10].mxu0 %vm55_vm1, %v650_v26 }
  0x34   :  { %2284 = vmatmul.mubr.msk.f32.vlgmr.msra.gmra.mrb[10].mxu1 %vm55_vm1, %v651_v28  ;;  %2444 = vmatpush3.bf16.msra.mxu0 %v2443_v27 }
  0x35   :  { %2450 = vmatpush3.bf16.msra.mxu1 %v2449_v29  ;;  %2445 = vmatprep.subr.bf16.mxu0 %v2528_v3 }
  0x36   :  { %2451 = vmatprep.subr.bf16.mxu1 %v2528_v3  ;;  %2294 = vmatprep.mubr.msk.f32.mxu0 %vm2529_vm0, %v2530_v11 }
  0x37   :  { %2305 = vmatprep.mubr.msk.f32.mxu1 %vm2529_vm0, %v2530_v11 }
  0x38   :  { %2447 = vmatpush3.bf16.msra.mxu0 %v2446_v34 }
  0x39   :  { %2453 = vmatpush3.bf16.msra.mxu1 %v2452_v35  ;;  %2454 = vmatprep.subr.bf16.mxu0 %v2528_v3 }
  0x3a   :  { %2460 = vmatprep.subr.bf16.mxu1 %v2528_v3 }
  0x3b   :  { %2295 = vmatmul.mubr.msk.f32.vlgmr.msra.gmra.mrb[12].mxu0 %vm55_vm1, %v652_v40 }
  0x3c   :  { %2306 = vmatmul.mubr.msk.f32.vlgmr.msra.gmra.mrb[12].mxu1 %vm55_vm1, %v653_v42  ;;  %2456 = vmatpush3.bf16.msra.mxu0 %v2455_v41 }
  0x3d   :  { %2462 = vmatpush3.bf16.msra.mxu1 %v2461_v43  ;;  %2457 = vmatprep.subr.bf16.mxu0 %v2528_v3 }
  0x3e   :  { %2463 = vmatprep.subr.bf16.mxu1 %v2528_v3  ;;  %2316 = vmatprep.mubr.msk.f32.mxu0 %vm2529_vm0, %v2530_v11 }
  0x3f   :  { %2327 = vmatprep.mubr.msk.f32.mxu1 %vm2529_vm0, %v2530_v11 }
  0x40   :  { %2459 = vmatpush3.bf16.msra.mxu0 %v2458_v48 }
  0x41   :  { %2465 = vmatpush3.bf16.msra.mxu1 %v2464_v49  ;;  %2330 = vmatprep.subr.mxu0 %v2530_v11 }
  0x42   :  { %2335 = vmatprep.subr.mxu1 %v2530_v11 }
  0x43   :  { %2317 = vmatmul.mubr.msk.f32.vlgmr.msra.gmra.mrb[14].mxu0 %vm55_vm1, %v654_v50 }
  0x44   :  { %2328 = vmatmul.mubr.msk.f32.vlgmr.msra.gmra.mrb[14].mxu1 %vm55_vm1, %v655_v51  ;;  %2332 = vmatprep.mubr.msk.f32.mxu0 %vm2529_vm0, %v2530_v11 }
  0x45   :  { %2337 = vmatprep.mubr.msk.f32.mxu1 %vm2529_vm0, %v2530_v11 }
  0xde   :  { %v125_v3 = vpop.f32.mrb[0].mxu0 }
  0xdf   :  { %v198_v52 = vpop.f32.mrb[0].mxu1  ;;  %v2164_v53 = vpop.f32.mrb[1].mxu0  ;;  %v640_v7 = vmul.f32 0.35355338, %v125_v3 }
  0xe0   :  { %v2175_v54 = vpop.f32.mrb[1].mxu1  ;;  %v641_v9 = vmul.f32 0.35355338, %v198_v52 }
  0xe6   :  { %v271_v55 = vpop.f32.mrb[2].mxu0 }
  0xe7   :  { %v344_v56 = vpop.f32.mrb[2].mxu1  ;;  %v2186_v57 = vpop.f32.mrb[3].mxu0  ;;  %v642_v14 = vmul.f32 0.35355338, %v271_v55 }
  0xe8   :  { %v2197_v58 = vpop.f32.mrb[3].mxu1  ;;  %v643_v16 = vmul.f32 0.35355338, %v344_v56 }
  0xee   :  { %v417_v59 = vpop.f32.mrb[4].mxu0 }
  0xef   :  { %v490_v60 = vpop.f32.mrb[4].mxu1  ;;  %v2208_v61 = vpop.f32.mrb[5].mxu0  ;;  %v644_v20 = vmul.f32 0.35355338, %v417_v59 }
  0xf0   :  { %v2219_v62 = vpop.f32.mrb[5].mxu1  ;;  %v645_v22 = vmul.f32 0.35355338, %v490_v60 }
  0xf6   :  { %v563_v63 = vpop.f32.mrb[6].mxu0 }
  0xf7   :  { %v636_v0 = vpop.f32.mrb[6].mxu1  ;;  %v2230_v1 = vpop.f32.mrb[7].mxu0  ;;  %v646_v26 = vmul.f32 0.35355338, %v563_v63 }
  0xf8   :  { %v2241_v2 = vpop.f32.mrb[7].mxu1  ;;  %v647_v28 = vmul.f32 0.35355338, %v636_v0 }
  0xfe   :  { %v758_v4 = vpop.f32.mrb[8].mxu0 }
  0xff   :  { %v831_v5 = vpop.f32.mrb[8].mxu1  ;;  %v2252_v6 = vpop.f32.mrb[9].mxu0  ;;  %2331 = vmatpush3.xpose.msk.msra.mxu0 %vm1273_vm2, %v758_v4 }
 0x100   :  { %v2263_v8 = vpop.f32.mrb[9].mxu1  ;;  %2336 = vmatpush3.xpose.msk.msra.mxu1 %vm1273_vm2, %v831_v5  ;;  %2340 = vmatprep.subr.mxu0 %v2530_v11 }
 0x101   :  { %2345 = vmatprep.subr.mxu1 %v2530_v11 }
 0x102   :  { %2333 = vmatmul.mubr.msk.f32.vlgmr.msra.gmra.mrb[16].mxu0 %vm1273_vm2, %v640_v7 }
 0x103   :  { %2338 = vmatmul.mubr.msk.f32.vlgmr.msra.gmra.mrb[16].mxu1 %vm1273_vm2, %v641_v9  ;;  %2342 = vmatprep.mubr.msk.f32.mxu0 %vm2529_vm0, %v2530_v11 }
 0x104   :  { %2347 = vmatprep.mubr.msk.f32.mxu1 %vm2529_vm0, %v2530_v11 }
 0x106   :  { %v904_v10 = vpop.f32.mrb[10].mxu0 }
 0x107   :  { %v977_v12 = vpop.f32.mrb[10].mxu1  ;;  %v2274_v13 = vpop.f32.mrb[11].mxu0  ;;  %2341 = vmatpush3.xpose.msk.msra.mxu0 %vm1273_vm2, %v904_v10 }
 0x108   :  { %v2285_v15 = vpop.f32.mrb[11].mxu1  ;;  %2346 = vmatpush3.xpose.msk.msra.mxu1 %vm1273_vm2, %v977_v12  ;;  %2350 = vmatprep.subr.mxu0 %v2530_v11 }
 0x109   :  { %2355 = vmatprep.subr.mxu1 %v2530_v11 }
 0x10a   :  { %2343 = vmatmul.mubr.msk.f32.vlgmr.msra.gmra.mrb[18].mxu0 %vm1273_vm2, %v642_v14 }
 0x10b   :  { %2348 = vmatmul.mubr.msk.f32.vlgmr.msra.gmra.mrb[18].mxu1 %vm1273_vm2, %v643_v16  ;;  %2352 = vmatprep.mubr.msk.f32.mxu0 %vm2529_vm0, %v2530_v11 }
 0x10c   :  { %2357 = vmatprep.mubr.msk.f32.mxu1 %vm2529_vm0, %v2530_v11 }
 0x10e   :  { %v1050_v17 = vpop.f32.mrb[12].mxu0 }
 0x10f   :  { %v1123_v18 = vpop.f32.mrb[12].mxu1  ;;  %v2296_v19 = vpop.f32.mrb[13].mxu0  ;;  %2351 = vmatpush3.xpose.msk.msra.mxu0 %vm1273_vm2, %v1050_v17 }
 0x110   :  { %v2307_v21 = vpop.f32.mrb[13].mxu1  ;;  %2356 = vmatpush3.xpose.msk.msra.mxu1 %vm1273_vm2, %v1123_v18  ;;  %2360 = vmatprep.subr.mxu0 %v2530_v11 }
 0x111   :  { %2365 = vmatprep.subr.mxu1 %v2530_v11 }
 0x112   :  { %2353 = vmatmul.mubr.msk.f32.vlgmr.msra.gmra.mrb[20].mxu0 %vm1273_vm2, %v644_v20 }
 0x113   :  { %2358 = vmatmul.mubr.msk.f32.vlgmr.msra.gmra.mrb[20].mxu1 %vm1273_vm2, %v645_v22  ;;  %2362 = vmatprep.mubr.msk.f32.mxu0 %vm2529_vm0, %v2530_v11 }
 0x114   :  { %2367 = vmatprep.mubr.msk.f32.mxu1 %vm2529_vm0, %v2530_v11 }
 0x116   :  { %v1196_v23 = vpop.f32.mrb[14].mxu0 }
 0x117   :  { %v1269_v24 = vpop.f32.mrb[14].mxu1  ;;  %v2318_v25 = vpop.f32.mrb[15].mxu0  ;;  %2361 = vmatpush3.xpose.msk.msra.mxu0 %vm1273_vm2, %v1196_v23 }
 0x118   :  { %v2329_v27 = vpop.f32.mrb[15].mxu1  ;;  %2366 = vmatpush3.xpose.msk.msra.mxu1 %vm1273_vm2, %v1269_v24 }
 0x11a   :  { %2363 = vmatmul.mubr.msk.f32.vlgmr.msra.gmra.mrb[22].mxu0 %vm1273_vm2, %v646_v26 }
 0x11b   :  { %2368 = vmatmul.mubr.msk.f32.vlgmr.msra.gmra.mrb[22].mxu1 %vm1273_vm2, %v647_v28 }
 0x1d5   :  { %v1346_v29 = vpop.f32.mrb[16].mxu0 }
 0x1d6   :  { %v1422_v30 = vpop.f32.mrb[16].mxu1  ;;  %v2334_v31 = vpop.f32.mrb[17].mxu0  ;;  %v1882_v32 = vsel %vm1273_vm2, %v1346_v29, -inf }
 0x1d7   :  { %v2339_v11 = vpop.f32.mrb[17].mxu1  ;;  %1883 = vmax.xlane.f32.xlu0 %v1882_v32  ;;  %v1885_v33 = vsel %vm1273_vm2, %v1422_v30, -inf }
 0x1db   :  { %1886 = vmax.xlane.f32.xlu0 %v1885_v33 }
 0x1dd   :  { %v1498_v34 = vpop.f32.mrb[18].mxu0 }
 0x1de   :  { %v1574_v35 = vpop.f32.mrb[18].mxu1  ;;  %v2344_v36 = vpop.f32.mrb[19].mxu0  ;;  %v1888_v37 = vsel %vm1273_vm2, %v1498_v34, -inf }
 0x1df   :  { %v2349_v38 = vpop.f32.mrb[19].mxu1  ;;  %1889 = vmax.xlane.f32.xlu1 %v1888_v37  ;;  %v1891_v39 = vsel %vm1273_vm2, %v1574_v35, -inf }
 0x1e3   :  { %1892 = vmax.xlane.f32.xlu1 %v1891_v39 }
 0x1e5   :  { %v1650_v40 = vpop.f32.mrb[20].mxu0 }
 0x1e6   :  { %v1726_v41 = vpop.f32.mrb[20].mxu1  ;;  %v2354_v42 = vpop.f32.mrb[21].mxu0  ;;  %v1894_v43 = vsel %vm1273_vm2, %v1650_v40, -inf }
 0x1e7   :  { %v2359_v44 = vpop.f32.mrb[21].mxu1  ;;  %v1897_v45 = vsel %vm1273_vm2, %v1726_v41, -inf  ;;  %1895 = vmax.xlane.f32.xlu0 %v1894_v43 }
 0x1e8   :  { %1898 = vmax.xlane.f32.xlu1 %v1897_v45 }
 0x1ed   :  { %v1802_v46 = vpop.f32.mrb[22].mxu0 }
 0x1ee   :  { %v1878_v47 = vpop.f32.mrb[22].mxu1  ;;  %v2364_v48 = vpop.f32.mrb[23].mxu0  ;;  %v1900_v49 = vsel %vm1273_vm2, %v1802_v46, -inf }
 0x1ef   :  { %v2369_v50 = vpop.f32.mrb[23].mxu1  ;;  %v1903_v51 = vsel %vm1273_vm2, %v1878_v47, -inf  ;;  %1901 = vmax.xlane.f32.xlu0 %v1900_v49 }
 0x1f0   :  { %1904 = vmax.xlane.f32.xlu1 %v1903_v51 }
 0x264   :  { %v1884_v3 = vpop.xlane.xlu0 %1883 }
 0x265   :  { %v1906_v52 = vsub.f32 %v1346_v29, %v1884_v3 }
 0x267   :  { %v1914_v53 = vmul.f32 1.442695, %v1906_v52 }
 0x268   :  { %v1887_v54 = vpop.xlane.xlu0 %1886 }
 0x269   :  { %2472 = vpow2.f32 %v1914_v53  ;;  %v1907_v55 = vsub.f32 %v1422_v30, %v1887_v54 }
 0x26b   :  { %v1916_v56 = vmul.f32 1.442695, %v1907_v55 }
 0x26c   :  { %v1890_v57 = vpop.xlane.xlu1 %1889 }
 0x26d   :  { %2474 = vpow2.f32 %v1916_v56  ;;  %v1908_v58 = vsub.f32 %v1498_v34, %v1890_v57 }
 0x26f   :  { %v1918_v59 = vmul.f32 1.442695, %v1908_v58 }
 0x270   :  { %v1893_v60 = vpop.xlane.xlu1 %1892 }
 0x271   :  { %2476 = vpow2.f32 %v1918_v59  ;;  %v1909_v61 = vsub.f32 %v1574_v35, %v1893_v60 }
 0x273   :  { %v2473_v62 = vpop.eup %2472  ;;  %v1920_v63 = vmul.f32 1.442695, %v1909_v61 }
 0x274   :  { %v1896_v0 = vpop.xlane.xlu0 %1895  ;;  %v1930_v1 = vsel %vm1273_vm2, %v2473_v62, 0.0 }
 0x275   :  { %2478 = vpow2.f32 %v1920_v63  ;;  %v1899_v2 = vpop.xlane.xlu1 %1898  ;;  %v1910_v4 = vsub.f32 %v1650_v40, %v1896_v0  ;;  %1931 = vadd.xlane.f32.xlu0 %v1930_v1 }
 0x276   :  { %v1911_v5 = vsub.f32 %v1726_v41, %v1899_v2 }
 0x277   :  { %v2475_v6 = vpop.eup %2474  ;;  %v1922_v7 = vmul.f32 1.442695, %v1910_v4 }
 0x278   :  { %v1924_v8 = vmul.f32 1.442695, %v1911_v5  ;;  %v1933_v9 = vsel %vm1273_vm2, %v2475_v6, 0.0 }
 0x279   :  { %2480 = vpow2.f32 %v1922_v7  ;;  %1934 = vadd.xlane.f32.xlu1 %v1933_v9 }
 0x27a   :  { %2482 = vpow2.f32 %v1924_v8 }
 0x27b   :  { %v2477_v10 = vpop.eup %2476 }
 0x27c   :  { %v1902_v12 = vpop.xlane.xlu0 %1901  ;;  %v1936_v13 = vsel %vm1273_vm2, %v2477_v10, 0.0 }
 0x27d   :  { %v1905_v14 = vpop.xlane.xlu1 %1904  ;;  %v1912_v15 = vsub.f32 %v1802_v46, %v1902_v12  ;;  %1937 = vadd.xlane.f32.xlu0 %v1936_v13 }
 0x27e   :  { %v1913_v16 = vsub.f32 %v1878_v47, %v1905_v14 }
 0x27f   :  { %v2479_v17 = vpop.eup %2478  ;;  %v1926_v18 = vmul.f32 1.442695, %v1912_v15 }
 0x280   :  { %v1928_v19 = vmul.f32 1.442695, %v1913_v16  ;;  %v1939_v20 = vsel %vm1273_vm2, %v2479_v17, 0.0 }
 0x281   :  { %2484 = vpow2.f32 %v1926_v18  ;;  %1940 = vadd.xlane.f32.xlu1 %v1939_v20 }
 0x282   :  { %2486 = vpow2.f32 %v1928_v19 }
 0x283   :  { %v2481_v21 = vpop.eup %2480 }
 0x284   :  { %v2483_v22 = vpop.eup %2482  ;;  %v1942_v23 = vsel %vm1273_vm2, %v2481_v21, 0.0 }
 0x285   :  { %v1945_v24 = vsel %vm1273_vm2, %v2483_v22, 0.0  ;;  %1943 = vadd.xlane.f32.xlu0 %v1942_v23 }
 0x286   :  { %1946 = vadd.xlane.f32.xlu1 %v1945_v24 }
 0x28b   :  { %v2485_v25 = vpop.eup %2484 }
 0x28c   :  { %v2487_v26 = vpop.eup %2486  ;;  %v1948_v27 = vsel %vm1273_vm2, %v2485_v25, 0.0 }
 0x28d   :  { %v1951_v28 = vsel %vm1273_vm2, %v2487_v26, 0.0  ;;  %1949 = vadd.xlane.f32.xlu0 %v1948_v27 }
 0x28e   :  { %1952 = vadd.xlane.f32.xlu1 %v1951_v28 }
 0x302   :  { %v1932_v29 = vpop.xlane.xlu0 %1931 }
 0x303   :  { %2488 = vrcp.f32 %v1932_v29 }
 0x306   :  { %v1935_v30 = vpop.xlane.xlu1 %1934 }
 0x307   :  { %2490 = vrcp.f32 %v1935_v30 }
 0x30a   :  { %v1938_v31 = vpop.xlane.xlu0 %1937 }
 0x30b   :  { %2492 = vrcp.f32 %v1938_v31 }
 0x30d   :  { %v2489_v32 = vpop.eup %2488 }
 0x30e   :  { %v1962_v11 = vmul.f32 %v2489_v32, %v2473_v62  ;;  %v1941_v33 = vpop.xlane.xlu1 %1940 }
 0x30f   :  { %2494 = vrcp.f32 %v1941_v33 }
 0x310   :  { %1970 = vst.msk [vmem:[#allocation2] sm:$0xff] %vm1273_vm2, %v1962_v11 }
 0x311   :  { %v2491_v34 = vpop.eup %2490 }
 0x312   :  { %v1963_v35 = vmul.f32 %v2491_v34, %v2475_v6  ;;  %v1944_v36 = vpop.xlane.xlu0 %1943 }
 0x313   :  { %v1947_v37 = vpop.xlane.xlu1 %1946  ;;  %2496 = vrcp.f32 %v1944_v36 }
 0x314   :  { %1971 = vst.msk [vmem:[#allocation2 + $0x8] sm:$0xff] %vm1273_vm2, %v1963_v35  ;;  %2498 = vrcp.f32 %v1947_v37 }
 0x315   :  { %v2493_v38 = vpop.eup %2492 }
 0x316   :  { %v1964_v39 = vmul.f32 %v2493_v38, %v2477_v10 }
 0x318   :  { %1972 = vst.msk [vmem:[#allocation2 + $0x10] sm:$0xff] %vm1273_vm2, %v1964_v39 }
 0x319   :  { %v2495_v40 = vpop.eup %2494 }
 0x31a   :  { %v1965_v41 = vmul.f32 %v2495_v40, %v2479_v17  ;;  %v1950_v42 = vpop.xlane.xlu0 %1949 }
 0x31b   :  { %v1953_v43 = vpop.xlane.xlu1 %1952  ;;  %2500 = vrcp.f32 %v1950_v42 }
 0x31c   :  { %1973 = vst.msk [vmem:[#allocation2 + $0x18] sm:$0xff] %vm1273_vm2, %v1965_v41  ;;  %2502 = vrcp.f32 %v1953_v43 }
 0x31d   :  { %v2497_v44 = vpop.eup %2496 }
 0x31e   :  { %v2499_v45 = vpop.eup %2498  ;;  %v1966_v46 = vmul.f32 %v2497_v44, %v2481_v21 }
 0x31f   :  { %v1967_v47 = vmul.f32 %v2499_v45, %v2483_v22 }
 0x320   :  { %1974 = vst.msk [vmem:[#allocation2 + $0x20] sm:$0xff] %vm1273_vm2, %v1966_v46 }
 0x321   :  { %1975 = vst.msk [vmem:[#allocation2 + $0x28] sm:$0xff] %vm1273_vm2, %v1967_v47 }
 0x325   :  { %v2501_v48 = vpop.eup %2500 }
 0x326   :  { %v2503_v49 = vpop.eup %2502  ;;  %v1968_v50 = vmul.f32 %v2501_v48, %v2485_v25 }
 0x327   :  { %v1969_v51 = vmul.f32 %v2503_v49, %v2487_v26 }
 0x328   :  { %1976 = vst.msk [vmem:[#allocation2 + $0x30] sm:$0xff] %vm1273_vm2, %v1968_v50 }
 0x329   :  { %1977 = vst.msk [vmem:[#allocation2 + $0x38] sm:$0xff] %vm1273_vm2, %v1969_v51 }
 0x32a   :  { %2515 = shalt.err (!%p2512_p4)
}
 0x32b   :  { %s2516_s10 = scalar_lea.hbm %s2953_s3, 1024 }
 0x32c   :  { %p2517_p5 = scmp.ne.s32.totalorder %s2953_s3, %s2516_s10  ;;  %p2520_p6 = scmp.lt.u32.totalorder %s2516_s10, %s2953_s3 }
 0x32e   :  { %p2522_p7 = pnand %p2520_p6, %p2517_p5 }
 0x330   :  { %2525 = shalt.err (!%p2522_p7)
}
 0x331   :  { %s2532_s15 = smov 128   ;;  %s2533_s16 = smov 8  }
 0x332   :  { %1989 = dma.vmem_to_hbm [thread:$0]  %s1984_s6, 1024, %s2953_s3, [#allocation3], %s2532_s15, %s2532_s15, %s2533_s16  }
 0x333   :  { %2526 = dma.done.wait [#allocation3], 1024  }
 0x334   :  { %2527 = vsyncadd [#allocation3], 4294966272 }
 0x335   :  { %1993 = vsyncpa [#allocation3], 1 }

</bundles_post_ra>
